<compile_context>
chip_gen: v7x
topology: tpu7x:2x2x1
jax: 0.10.0
libtpu: 0.0.40
codegen_flags: <defaults>
</compile_context>

<pallas_src>
import functools

import jax
import jax.numpy as jnp
from jax.experimental import pallas as pl
from jax.experimental.pallas import tpu as pltpu


def _residual_block_kernel(x_ref, w1_ref, w2_ref, s1_ref, b1_ref, s2_ref, b2_ref,
                           out_ref, *, H, WC):
    """One batch element (the whole image) of the fused residual block.

    x_ref  : (1, H, WC)   lane-dense input rows (row = y, lane = x*C + c)
    w*_ref : (3, WC, WC)  per-ky banded (block-Toeplitz over width) conv weights
    s*/b*  : (1, WC)      folded BatchNorm scale / bias, tiled per (x, c) lane
    out_ref: (1, H, WC)   lane-dense output block
    """
    xb = x_ref[0]                                    # (H, WC)
    zrow = jnp.zeros((1, WC), jnp.float32)

    def conv3x3(inp, w_ref):
        # Width taps + channels are folded into each (WC, WC) band matrix (the
        # band implements the width-direction zero padding).  The three height
        # taps are three accumulating MXU matmuls; a one-row shift with a zero
        # row supplies the height-direction 'SAME' zero padding.
        t0 = jnp.dot(inp, w_ref[0], preferred_element_type=jnp.float32)  # row r -> r+1
        t1 = jnp.dot(inp, w_ref[1], preferred_element_type=jnp.float32)  # row r -> r
        t2 = jnp.dot(inp, w_ref[2], preferred_element_type=jnp.float32)  # row r -> r-1
        return (t1
                + jnp.concatenate([zrow, t0[:H - 1]], axis=0)
                + jnp.concatenate([t2[1:], zrow], axis=0))

    # conv1 -> BN1 (folded affine) -> ReLU, fully lane-dense.
    h1 = jnp.maximum(conv3x3(xb, w1_ref) * s1_ref[...] + b1_ref[...], 0.0)
    # conv2 -> BN2 -> +identity residual -> ReLU, full-width lane-dense store.
    c2 = conv3x3(h1, w2_ref)
    out = jnp.maximum(c2 * s2_ref[...] + b2_ref[...] + xb, 0.0)
    out_ref[0] = out.astype(out_ref.dtype)


def _banded_conv_weights(w_hwio, W):
    """Fold the kx taps + input channels of a 3x3 'SAME' conv into per-ky bands.

    Returns (3, W*C, W*C): slice [ky] has row (xin*C + ci), col (xout*C + co)
    holding w[ky, xin-xout+1, ci, co] inside the band, 0 outside — the band
    structure implements the width-direction zero padding.
    NOTE: O((W*C)^2) memory per tap — intended for modest W*C (here 128);
    larger feature maps would additionally tile along W.
    """
    C = w_hwio.shape[2]
    xin = jnp.arange(W)[:, None]
    xout = jnp.arange(W)[None, :]
    kx = xin - xout + 1
    valid = (kx >= 0) & (kx <= 2)
    kx_c = jnp.clip(kx, 0, 2)
    mats = []
    for ky in range(3):
        m = w_hwio[ky][kx_c]                               # (W, W, C, C)
        m = jnp.where(valid[:, :, None, None], m, 0.0)
        m = m.transpose(0, 2, 1, 3).reshape(W * C, W * C)  # (xin*C+ci, xout*C+co)
        mats.append(m)
    return jnp.stack(mats, axis=0)                         # (3, W*C, W*C)


@jax.jit
def residual_block_rows(x_rows, w1, w2, scale1, bias1, scale2, bias2):
    """Fused ResdiualBlock forward on lane-dense activations.

    x_rows : (N, H, W*C) float32, lane index = x*C + c.  Returns same layout.
    w1, w2 : (C, C, 3, 3) float32 (OIHW, PyTorch layout), bias=False convs.
    scale*/bias*: (C,) folded eval-mode BatchNorm scale / bias.
    """
    N, H, WC = x_rows.shape
    C = scale1.shape[0]
    W = WC // C

    # OIHW -> HWIO -> per-ky banded matmul weights (built once, VMEM-resident).
    w1_big = _banded_conv_weights(jnp.transpose(w1, (2, 3, 1, 0)), W)
    w2_big = _banded_conv_weights(jnp.transpose(w2, (2, 3, 1, 0)), W)

    # Folded-BN scale/bias tiled to one lane-dense row (lane index = x*C + c).
    s1r = jnp.tile(scale1, W).reshape(1, WC)
    b1r = jnp.tile(bias1, W).reshape(1, WC)
    s2r = jnp.tile(scale2, W).reshape(1, WC)
    b2r = jnp.tile(bias2, W).reshape(1, WC)

    kernel = functools.partial(_residual_block_kernel, H=H, WC=WC)

    def const_spec(shape):
        # Constant block index -> fetched once, stays VMEM-resident across grid.
        return pl.BlockSpec(shape, lambda b, _s=len(shape): (0,) * _s)

    return pl.pallas_call(
        kernel,
        out_shape=jax.ShapeDtypeStruct((N, H, WC), jnp.float32),
        grid=(N,),
        in_specs=[
            pl.BlockSpec((1, H, WC), lambda b: (b, 0, 0)),   # auto-pipelined input
            const_spec((3, WC, WC)),                         # conv1 banded weights
            const_spec((3, WC, WC)),                         # conv2 banded weights
            const_spec((1, WC)),                             # BN1 scale row
            const_spec((1, WC)),                             # BN1 bias row
            const_spec((1, WC)),                             # BN2 scale row
            const_spec((1, WC)),                             # BN2 bias row
        ],
        out_specs=pl.BlockSpec((1, H, WC), lambda b: (b, 0, 0)),
        compiler_params=pltpu.CompilerParams(
            # Batch axis parallel: shards across v7x's 2 TensorCores.
            dimension_semantics=("parallel",),
        ),
    )(x_rows, w1_big, w2_big, s1r, b1r, s2r, b2r)


@jax.jit
def residual_block(x, w1, w2, scale1, bias1, scale2, bias2):
    """NCHW wrapper matching the PyTorch module interface.

    In a real NHWC / channels-last graph, call residual_block_rows directly and
    keep the lane-dense layout around the block to avoid these two transposes.
    """
    N, C, H, W = x.shape
    x_rows = jnp.transpose(x, (0, 2, 3, 1)).reshape(N, H, W * C)
    out = residual_block_rows(x_rows, w1, w2, scale1, bias1, scale2, bias2)
    return jnp.transpose(out.reshape(N, H, W, C), (0, 3, 1, 2))


def _reference(x, w1, w2, s1, b1, s2, b2):
    """Plain-JAX (XLA conv) reference for numerical verification. NCHW in/out."""
    xh = jnp.transpose(x, (0, 2, 3, 1))
    w1h = jnp.transpose(w1, (2, 3, 1, 0))
    w2h = jnp.transpose(w2, (2, 3, 1, 0))

    def conv3x3(inp, w):
        return jax.lax.conv_general_dilated(
            inp, w, window_strides=(1, 1), padding="SAME",
            dimension_numbers=("NHWC", "HWIO", "NHWC"))

    h = jnp.maximum(conv3x3(xh, w1h) * s1 + b1, 0.0)
    out = jnp.maximum(conv3x3(h, w2h) * s2 + b2 + xh, 0.0)
    return jnp.transpose(out, (0, 3, 1, 2))


if __name__ == "__main__":
    N, C, H, W = 2, 8, 16, 16        # inchannel == outchannel == 8, stride = 1
    key = jax.random.PRNGKey(0)
    (kx, kw1, kw2, kg1, kb1, km1, kv1, kg2, kb2, km2, kv2) = jax.random.split(key, 11)

    x = jax.random.normal(kx, (N, C, H, W), dtype=jnp.float32)

    # Conv weights, OIHW layout (PyTorch), deterministic init.
    w1 = jax.random.normal(kw1, (C, C, 3, 3), dtype=jnp.float32) * 0.1
    w2 = jax.random.normal(kw2, (C, C, 3, 3), dtype=jnp.float32) * 0.1

    # Eval-mode BatchNorm params, folded to per-channel scale/bias.
    eps = 1e-5
    gamma1 = 1.0 + 0.1 * jax.random.normal(kg1, (C,), dtype=jnp.float32)
    beta1 = 0.1 * jax.random.normal(kb1, (C,), dtype=jnp.float32)
    mean1 = 0.1 * jax.random.normal(km1, (C,), dtype=jnp.float32)
    var1 = jnp.abs(jax.random.normal(kv1, (C,), dtype=jnp.float32)) + 0.5
    gamma2 = 1.0 + 0.1 * jax.random.normal(kg2, (C,), dtype=jnp.float32)
    beta2 = 0.1 * jax.random.normal(kb2, (C,), dtype=jnp.float32)
    mean2 = 0.1 * jax.random.normal(km2, (C,), dtype=jnp.float32)
    var2 = jnp.abs(jax.random.normal(kv2, (C,), dtype=jnp.float32)) + 0.5

    scale1 = gamma1 / jnp.sqrt(var1 + eps)
    bias1 = beta1 - mean1 * scale1
    scale2 = gamma2 / jnp.sqrt(var2 + eps)
    bias2 = beta2 - mean2 * scale2

    out = residual_block(x, w1, w2, scale1, bias1, scale2, bias2)
    out = jax.block_until_ready(out)

    ref = _reference(x, w1, w2, scale1, bias1, scale2, bias2)
    assert out.shape == (N, C, H, W)
    err = jnp.max(jnp.abs(out - ref))
    assert jnp.allclose(out, ref, atol=1e-3, rtol=1e-3), f"max abs err {err}"

    print("KERNEL_OK")
</pallas_src>

<mosaic_0001>
module attributes {stable_mosaic.version = 11 : i64} {
  func.func @_residual_block_kernel(%arg0: i32, %arg1: memref<1x16x128xf32, #tpu.memory_space<vmem>>, %arg2: memref<3x128x128xf32, #tpu.memory_space<vmem>>, %arg3: memref<3x128x128xf32, #tpu.memory_space<vmem>>, %arg4: memref<1x128xf32, #tpu.memory_space<vmem>>, %arg5: memref<1x128xf32, #tpu.memory_space<vmem>>, %arg6: memref<1x128xf32, #tpu.memory_space<vmem>>, %arg7: memref<1x128xf32, #tpu.memory_space<vmem>>, %arg8: memref<1x16x128xf32, #tpu.memory_space<vmem>>) attributes {dimension_semantics = [#tpu.dimension_semantics<parallel>], iteration_bounds = array<i64: 2>, scalar_prefetch = 0 : i64, scratch_operands = 0 : i64, tpu.core_type = #tpu.core_type<tc>, window_params = [{transform_indices = @transform_0, window_bounds = array<i64: 1, 16, 128>}, {pipeline_mode = #tpu.pipeline_mode<synchronous>, transform_indices = @transform_1, window_bounds = array<i64: 3, 128, 128>}, {pipeline_mode = #tpu.pipeline_mode<synchronous>, transform_indices = @transform_2, window_bounds = array<i64: 3, 128, 128>}, {pipeline_mode = #tpu.pipeline_mode<synchronous>, transform_indices = @transform_3, window_bounds = array<i64: 1, 128>}, {pipeline_mode = #tpu.pipeline_mode<synchronous>, transform_indices = @transform_4, window_bounds = array<i64: 1, 128>}, {pipeline_mode = #tpu.pipeline_mode<synchronous>, transform_indices = @transform_5, window_bounds = array<i64: 1, 128>}, {pipeline_mode = #tpu.pipeline_mode<synchronous>, transform_indices = @transform_6, window_bounds = array<i64: 1, 128>}, {transform_indices = @transform_7, window_bounds = array<i64: 1, 16, 128>}]} {
    %c0 = arith.constant 0 : index
    %c0_0 = arith.constant 0 : index
    %c0_1 = arith.constant 0 : index
    %0 = vector.load %arg1[%c0, %c0_0, %c0_1] : memref<1x16x128xf32, #tpu.memory_space<vmem>>, vector<1x16x128xf32>
    %1 = vector.shape_cast %0 : vector<1x16x128xf32> to vector<16x128xf32>
    %cst = arith.constant 0.000000e+00 : f32
    %2 = vector.broadcast %cst : f32 to vector<1x128xf32>
    %c0_2 = arith.constant 0 : index
    %c0_3 = arith.constant 0 : index
    %c0_4 = arith.constant 0 : index
    %3 = vector.load %arg2[%c0_2, %c0_3, %c0_4] : memref<3x128x128xf32, #tpu.memory_space<vmem>>, vector<1x128x128xf32>
    %4 = vector.shape_cast %3 : vector<1x128x128xf32> to vector<128x128xf32>
    %cst_5 = arith.constant dense<0.000000e+00> : vector<16x128xf32>
    %5 = tpu.matmul %1, %4, %cst_5 {dimension_numbers = #tpu.dot_dimension_numbers<[1], [0], [0], [1], [0, 0, 1, 1], [], []>} : vector<16x128xf32>, vector<128x128xf32>, vector<16x128xf32> -> vector<16x128xf32>
    %c1 = arith.constant 1 : index
    %c0_6 = arith.constant 0 : index
    %c0_7 = arith.constant 0 : index
    %6 = vector.load %arg2[%c1, %c0_6, %c0_7] : memref<3x128x128xf32, #tpu.memory_space<vmem>>, vector<1x128x128xf32>
    %7 = vector.shape_cast %6 : vector<1x128x128xf32> to vector<128x128xf32>
    %cst_8 = arith.constant dense<0.000000e+00> : vector<16x128xf32>
    %8 = tpu.matmul %1, %7, %cst_8 {dimension_numbers = #tpu.dot_dimension_numbers<[1], [0], [0], [1], [0, 0, 1, 1], [], []>} : vector<16x128xf32>, vector<128x128xf32>, vector<16x128xf32> -> vector<16x128xf32>
    %c2 = arith.constant 2 : index
    %c0_9 = arith.constant 0 : index
    %c0_10 = arith.constant 0 : index
    %9 = vector.load %arg2[%c2, %c0_9, %c0_10] : memref<3x128x128xf32, #tpu.memory_space<vmem>>, vector<1x128x128xf32>
    %10 = vector.shape_cast %9 : vector<1x128x128xf32> to vector<128x128xf32>
    %cst_11 = arith.constant dense<0.000000e+00> : vector<16x128xf32>
    %11 = tpu.matmul %1, %10, %cst_11 {dimension_numbers = #tpu.dot_dimension_numbers<[1], [0], [0], [1], [0, 0, 1, 1], [], []>} : vector<16x128xf32>, vector<128x128xf32>, vector<16x128xf32> -> vector<16x128xf32>
    %12 = vector.extract_strided_slice %5 {offsets = [0, 0], sizes = [15, 128], strides = [1, 1]} : vector<16x128xf32> to vector<15x128xf32>
    %13 = tpu.concatenate %2, %12 in 0 : vector<1x128xf32>, vector<15x128xf32> -> vector<16x128xf32>
    %14 = arith.addf %8, %13 : vector<16x128xf32>
    %15 = vector.extract_strided_slice %11 {offsets = [1, 0], sizes = [15, 128], strides = [1, 1]} : vector<16x128xf32> to vector<15x128xf32>
    %16 = tpu.concatenate %15, %2 in 0 : vector<15x128xf32>, vector<1x128xf32> -> vector<16x128xf32>
    %17 = arith.addf %14, %16 : vector<16x128xf32>
    %c0_12 = arith.constant 0 : index
    %c0_13 = arith.constant 0 : index
    %18 = vector.load %arg4[%c0_12, %c0_13] : memref<1x128xf32, #tpu.memory_space<vmem>>, vector<1x128xf32>
    %19 = vector.broadcast %18 : vector<1x128xf32> to vector<16x128xf32>
    %20 = arith.mulf %17, %19 : vector<16x128xf32>
    %c0_14 = arith.constant 0 : index
    %c0_15 = arith.constant 0 : index
    %21 = vector.load %arg5[%c0_14, %c0_15] : memref<1x128xf32, #tpu.memory_space<vmem>>, vector<1x128xf32>
    %22 = vector.broadcast %21 : vector<1x128xf32> to vector<16x128xf32>
    %23 = arith.addf %20, %22 : vector<16x128xf32>
    %cst_16 = arith.constant 0.000000e+00 : f32
    %24 = vector.broadcast %cst_16 : f32 to vector<16x128xf32>
    %25 = arith.maximumf %23, %24 : vector<16x128xf32>
    %c0_17 = arith.constant 0 : index
    %c0_18 = arith.constant 0 : index
    %c0_19 = arith.constant 0 : index
    %26 = vector.load %arg3[%c0_17, %c0_18, %c0_19] : memref<3x128x128xf32, #tpu.memory_space<vmem>>, vector<1x128x128xf32>
    %27 = vector.shape_cast %26 : vector<1x128x128xf32> to vector<128x128xf32>
    %cst_20 = arith.constant dense<0.000000e+00> : vector<16x128xf32>
    %28 = tpu.matmul %25, %27, %cst_20 {dimension_numbers = #tpu.dot_dimension_numbers<[1], [0], [0], [1], [0, 0, 1, 1], [], []>} : vector<16x128xf32>, vector<128x128xf32>, vector<16x128xf32> -> vector<16x128xf32>
    %c1_21 = arith.constant 1 : index
    %c0_22 = arith.constant 0 : index
    %c0_23 = arith.constant 0 : index
    %29 = vector.load %arg3[%c1_21, %c0_22, %c0_23] : memref<3x128x128xf32, #tpu.memory_space<vmem>>, vector<1x128x128xf32>
    %30 = vector.shape_cast %29 : vector<1x128x128xf32> to vector<128x128xf32>
    %cst_24 = arith.constant dense<0.000000e+00> : vector<16x128xf32>
    %31 = tpu.matmul %25, %30, %cst_24 {dimension_numbers = #tpu.dot_dimension_numbers<[1], [0], [0], [1], [0, 0, 1, 1], [], []>} : vector<16x128xf32>, vector<128x128xf32>, vector<16x128xf32> -> vector<16x128xf32>
    %c2_25 = arith.constant 2 : index
    %c0_26 = arith.constant 0 : index
    %c0_27 = arith.constant 0 : index
    %32 = vector.load %arg3[%c2_25, %c0_26, %c0_27] : memref<3x128x128xf32, #tpu.memory_space<vmem>>, vector<1x128x128xf32>
    %33 = vector.shape_cast %32 : vector<1x128x128xf32> to vector<128x128xf32>
    %cst_28 = arith.constant dense<0.000000e+00> : vector<16x128xf32>
    %34 = tpu.matmul %25, %33, %cst_28 {dimension_numbers = #tpu.dot_dimension_numbers<[1], [0], [0], [1], [0, 0, 1, 1], [], []>} : vector<16x128xf32>, vector<128x128xf32>, vector<16x128xf32> -> vector<16x128xf32>
    %35 = vector.extract_strided_slice %28 {offsets = [0, 0], sizes = [15, 128], strides = [1, 1]} : vector<16x128xf32> to vector<15x128xf32>
    %36 = tpu.concatenate %2, %35 in 0 : vector<1x128xf32>, vector<15x128xf32> -> vector<16x128xf32>
    %37 = arith.addf %31, %36 : vector<16x128xf32>
    %38 = vector.extract_strided_slice %34 {offsets = [1, 0], sizes = [15, 128], strides = [1, 1]} : vector<16x128xf32> to vector<15x128xf32>
    %39 = tpu.concatenate %38, %2 in 0 : vector<15x128xf32>, vector<1x128xf32> -> vector<16x128xf32>
    %40 = arith.addf %37, %39 : vector<16x128xf32>
    %c0_29 = arith.constant 0 : index
    %c0_30 = arith.constant 0 : index
    %41 = vector.load %arg6[%c0_29, %c0_30] : memref<1x128xf32, #tpu.memory_space<vmem>>, vector<1x128xf32>
    %42 = vector.broadcast %41 : vector<1x128xf32> to vector<16x128xf32>
    %43 = arith.mulf %40, %42 : vector<16x128xf32>
    %c0_31 = arith.constant 0 : index
    %c0_32 = arith.constant 0 : index
    %44 = vector.load %arg7[%c0_31, %c0_32] : memref<1x128xf32, #tpu.memory_space<vmem>>, vector<1x128xf32>
    %45 = vector.broadcast %44 : vector<1x128xf32> to vector<16x128xf32>
    %46 = arith.addf %43, %45 : vector<16x128xf32>
    %47 = arith.addf %46, %1 : vector<16x128xf32>
    %cst_33 = arith.constant 0.000000e+00 : f32
    %48 = vector.broadcast %cst_33 : f32 to vector<16x128xf32>
    %49 = arith.maximumf %47, %48 : vector<16x128xf32>
    %c0_34 = arith.constant 0 : index
    %c0_35 = arith.constant 0 : index
    %c0_36 = arith.constant 0 : index
    %50 = vector.load %arg8[%c0_34, %c0_35, %c0_36] : memref<1x16x128xf32, #tpu.memory_space<vmem>>, vector<1x16x128xf32>
    %51 = vector.shape_cast %50 : vector<1x16x128xf32> to vector<16x128xf32>
    %52 = vector.shape_cast %49 : vector<16x128xf32> to vector<1x16x128xf32>
    tpu.vector_store %arg8[%c0_34, %c0_35, %c0_36], %52 {strides = array<i32>} : memref<1x16x128xf32, #tpu.memory_space<vmem>>, vector<1x16x128xf32>,
    return
  }
  func.func @transform_0(%arg0: i32) -> (i32, i32, i32) {
    %c0_i32 = arith.constant 0 : i32
    %c0_i32_0 = arith.constant 0 : i32
    %c0_i32_1 = arith.constant 0 : i32
    return %arg0, %c0_i32, %c0_i32_0 : i32, i32, i32
  }
  func.func @transform_1(%arg0: i32) -> (i32, i32, i32) {
    %c0_i32 = arith.constant 0 : i32
    %c0_i32_0 = arith.constant 0 : i32
    %c0_i32_1 = arith.constant 0 : i32
    %c0_i32_2 = arith.constant 0 : i32
    return %c0_i32, %c0_i32_0, %c0_i32_1 : i32, i32, i32
  }
  func.func @transform_2(%arg0: i32) -> (i32, i32, i32) {
    %c0_i32 = arith.constant 0 : i32
    %c0_i32_0 = arith.constant 0 : i32
    %c0_i32_1 = arith.constant 0 : i32
    %c0_i32_2 = arith.constant 0 : i32
    return %c0_i32, %c0_i32_0, %c0_i32_1 : i32, i32, i32
  }
  func.func @transform_3(%arg0: i32) -> (i32, i32) {
    %c0_i32 = arith.constant 0 : i32
    %c0_i32_0 = arith.constant 0 : i32
    %c0_i32_1 = arith.constant 0 : i32
    return %c0_i32, %c0_i32_0 : i32, i32
  }
  func.func @transform_4(%arg0: i32) -> (i32, i32) {
    %c0_i32 = arith.constant 0 : i32
    %c0_i32_0 = arith.constant 0 : i32
    %c0_i32_1 = arith.constant 0 : i32
    return %c0_i32, %c0_i32_0 : i32, i32
  }
  func.func @transform_5(%arg0: i32) -> (i32, i32) {
    %c0_i32 = arith.constant 0 : i32
    %c0_i32_0 = arith.constant 0 : i32
    %c0_i32_1 = arith.constant 0 : i32
    return %c0_i32, %c0_i32_0 : i32, i32
  }
  func.func @transform_6(%arg0: i32) -> (i32, i32) {
    %c0_i32 = arith.constant 0 : i32
    %c0_i32_0 = arith.constant 0 : i32
    %c0_i32_1 = arith.constant 0 : i32
    return %c0_i32, %c0_i32_0 : i32, i32
  }
  func.func @transform_7(%arg0: i32) -> (i32, i32, i32) {
    %c0_i32 = arith.constant 0 : i32
    %c0_i32_0 = arith.constant 0 : i32
    %c0_i32_1 = arith.constant 0 : i32
    return %arg0, %c0_i32, %c0_i32_0 : i32, i32, i32
  }
}

</mosaic_0001>

<bundles_post_ra>
// kernel: tile.23
= control target key start
LH: loop header
LB: loop body
LE: loop exit
PB: predicated region body
PF: predicated region fallthrough
CT: control target
= control target key end

     0   :  { %s28_s0 = inlined_call_operand.vmem [shape: f32[8], index: 0, kind: input, shape index: {}]   ;;  %s29_s1 = inlined_call_operand.vmem [shape: f32[16,8], index: 1, kind: output, shape index: {}]  }
   0x1   :  { %v4_v0 = vld [vmem:[%s28_s0] ss:$0 sm:$0xff] }
   0x2   :  { %5 = vst [vmem:[%s29_s1] sm:$0xff] %v4_v0  ;;  %8 = vst [vmem:[%s29_s1 + $0x8] sm:$0xff] %v4_v0 }

// kernel: tile.24
= control target key start
LH: loop header
LB: loop body
LE: loop exit
PB: predicated region body
PF: predicated region fallthrough
CT: control target
= control target key end

     0   :  { %s131_s10 = smov 120   ;;  %s132_s11 = smov 104   ;;  %vm3_vm0 = vcmask 64512   ;;  %vm9_vm1 = vcmask 1048512   ;;  %vm15_vm2 = vcmask 982912   ;;  %vm21_vm3 = vcmask 917312   ;;  %s207_s0 = inlined_call_operand.vmem [shape: f32[16,8], index: 0, kind: input, shape index: {}]   ;;  %s208_s1 = inlined_call_operand.vmem [shape: f32[1,128], index: 1, kind: output, shape index: {}]  }
   0x1   :  { %v101_v0 = vld [vmem:[%s207_s0 + $0xf] sm:$0x1]   ;;  %v103_v1 = vld [vmem:[%s207_s0 + $0xd] sm:$0x1]   ;;  %v102_v2 = vld [vmem:[%s207_s0 + $0xe] sm:$0x1]  }
   0x2   :  { %7 = vrot.lane.b32.xlu0 %v101_v0, %s131_s10  ;;  %19 = vrot.lane.b32.xlu1 %v103_v1, %s132_s11  ;;  %v104_v3 = vld [vmem:[%s207_s0 + $0xc] sm:$0x1]   ;;  %s133_s16 = smov 112   ;;  %s134_s17 = smov 96   ;;  %v105_v4 = vld [vmem:[%s207_s0 + $0xb] sm:$0x1]  }
   0x3   :  { %v106_v5 = vld [vmem:[%s207_s0 + $0xa] sm:$0x1]   ;;  %v2_v6 = vld [vmem:[%s207_s0] sm:$0x1]   ;;  %s135_s24 = smov 88   ;;  %s136_s25 = smov 80  }
   0x4   :  { %4 = vst.msk [vmem:[#allocation0] sm:$0x1] %vm3_vm0, %v2_v6   ;;  %v107_v7 = vld [vmem:[%s207_s0 + $0x9] sm:$0x1]   ;;  %v108_v8 = vld [vmem:[%s207_s0 + $0x8] sm:$0x1]  }
   0x5   :  { %s137_s30 = smov 72   ;;  %s138_s2 = smov 64   ;;  %v109_v9 = vld [vmem:[%s207_s0 + $0x7] sm:$0x1]   ;;  %v110_v10 = vld [vmem:[%s207_s0 + $0x6] sm:$0x1]  }
   0x6   :  { %13 = vrot.lane.b32.xlu0 %v102_v2, %s133_s16  ;;  %25 = vrot.lane.b32.xlu1 %v104_v3, %s134_s17  ;;  %s139_s7 = smov 56   ;;  %s140_s8 = smov 48   ;;  %v111_v11 = vld [vmem:[%s207_s0 + $0x5] sm:$0x1]   ;;  %v112_v12 = vld [vmem:[%s207_s0 + $0x4] sm:$0x1]  }
   0x7   :  { %s141_s13 = smov 40   ;;  %s142_s14 = smov 32   ;;  %v113_v13 = vld [vmem:[%s207_s0 + $0x3] sm:$0x1]   ;;  %v114_v14 = vld [vmem:[%s207_s0 + $0x2] sm:$0x1]  }
   0x8   :  { %s143_s19 = smov 24   ;;  %s144_s20 = smov 16   ;;  %v115_v15 = vld [vmem:[%s207_s0 + $0x1] sm:$0x1]   ;;  %vm27_vm4 = vcmask 851712   ;;  %vm33_vm5 = vcmask 786112  }
   0x9   :  { %s145_s0 = smov 8   ;;  %vm39_vm6 = vcmask 720512   ;;  %vm45_vm7 = vcmask 654912   ;;  %vm51_vm8 = vcmask 589312   ;;  %vm57_vm9 = vcmask 523712  }
   0xa   :  { %31 = vrot.lane.b32.xlu0 %v105_v4, %s135_s24  ;;  %37 = vrot.lane.b32.xlu1 %v106_v5, %s136_s25  ;;  %vm63_vm10 = vcmask 458112   ;;  %vm69_vm11 = vcmask 392512   ;;  %vm75_vm12 = vcmask 326912   ;;  %vm81_vm13 = vcmask 261312  }
   0xb   :  { %vm87_vm14 = vcmask 195712   ;;  %vm93_vm15 = vcmask 130112  }
   0xe   :  { %43 = vrot.lane.b32.xlu0 %v107_v7, %s137_s30  ;;  %49 = vrot.lane.b32.xlu1 %v108_v8, %s138_s2 }
  0x12   :  { %55 = vrot.lane.b32.xlu0 %v109_v9, %s139_s7  ;;  %61 = vrot.lane.b32.xlu1 %v110_v10, %s140_s8 }
  0x16   :  { %67 = vrot.lane.b32.xlu0 %v111_v11, %s141_s13  ;;  %73 = vrot.lane.b32.xlu1 %v112_v12, %s142_s14 }
  0x1a   :  { %79 = vrot.lane.b32.xlu0 %v113_v13, %s143_s19  ;;  %85 = vrot.lane.b32.xlu1 %v114_v14, %s144_s20 }
  0x1e   :  { %91 = vrot.lane.b32.xlu0 %v115_v15, %s145_s0 }
  0x74   :  { %v8_v16 = vpop.permute.xlu0 %7   ;;  %v20_v17 = vpop.permute.xlu1 %19  }
  0x75   :  { %10 = vst.msk [vmem:[#allocation0] sm:$0x1] %vm9_vm1, %v8_v16  }
  0x78   :  { %v14_v18 = vpop.permute.xlu0 %13   ;;  %v26_v19 = vpop.permute.xlu1 %25  }
  0x79   :  { %16 = vst.msk [vmem:[#allocation0] sm:$0x1] %vm15_vm2, %v14_v18  }
  0x7a   :  { %22 = vst.msk [vmem:[#allocation0] sm:$0x1] %vm21_vm3, %v20_v17  }
  0x7b   :  { %28 = vst.msk [vmem:[#allocation0] sm:$0x1] %vm27_vm4, %v26_v19  }
  0x7c   :  { %v32_v20 = vpop.permute.xlu0 %31   ;;  %v38_v21 = vpop.permute.xlu1 %37  }
  0x7d   :  { %34 = vst.msk [vmem:[#allocation0] sm:$0x1] %vm33_vm5, %v32_v20  }
  0x7e   :  { %40 = vst.msk [vmem:[#allocation0] sm:$0x1] %vm39_vm6, %v38_v21  }
  0x80   :  { %v44_v22 = vpop.permute.xlu0 %43   ;;  %v50_v23 = vpop.permute.xlu1 %49  }
  0x81   :  { %46 = vst.msk [vmem:[#allocation0] sm:$0x1] %vm45_vm7, %v44_v22  }
  0x82   :  { %52 = vst.msk [vmem:[#allocation0] sm:$0x1] %vm51_vm8, %v50_v23  }
  0x84   :  { %v56_v24 = vpop.permute.xlu0 %55   ;;  %v62_v25 = vpop.permute.xlu1 %61  }
  0x85   :  { %58 = vst.msk [vmem:[#allocation0] sm:$0x1] %vm57_vm9, %v56_v24  }
  0x86   :  { %64 = vst.msk [vmem:[#allocation0] sm:$0x1] %vm63_vm10, %v62_v25  }
  0x88   :  { %v68_v26 = vpop.permute.xlu0 %67   ;;  %v74_v27 = vpop.permute.xlu1 %73  }
  0x89   :  { %70 = vst.msk [vmem:[#allocation0] sm:$0x1] %vm69_vm11, %v68_v26  }
  0x8a   :  { %76 = vst.msk [vmem:[#allocation0] sm:$0x1] %vm75_vm12, %v74_v27  }
  0x8c   :  { %v80_v28 = vpop.permute.xlu0 %79   ;;  %v86_v29 = vpop.permute.xlu1 %85  }
  0x8d   :  { %82 = vst.msk [vmem:[#allocation0] sm:$0x1] %vm81_vm13, %v80_v28  }
  0x8e   :  { %88 = vst.msk [vmem:[#allocation0] sm:$0x1] %vm87_vm14, %v86_v29  }
  0x90   :  { %v92_v30 = vpop.permute.xlu0 %91  }
  0x91   :  { %94 = vst.msk [vmem:[#allocation0] sm:$0x1] %vm93_vm15, %v92_v30  }
  0x98   :  { %v98_v31 = vld [vmem:[#allocation0] sm:$0x1] }
  0x99   :  { %100 = vst [vmem:[%s208_s1] sm:$0x1] %v98_v31 }

// kernel: residual_block_rows.1
= control target key start
LH: loop header
LB: loop body
LE: loop exit
PB: predicated region body
PF: predicated region fallthrough
CT: control target
= control target key end

     0   :  { %12 = vsyncpa [#allocation3], 0  ;;  %s2154_s0 = inlined_call_operand.vmem [shape: f32[2,16,128], index: 0, kind: input, shape index: {}]   ;;  %s2155_s1 = inlined_call_operand.vmem [shape: f32[3,128,128], index: 1, kind: input, shape index: {}]   ;;  %s2156_s2 = inlined_call_operand.vmem [shape: f32[3,128,128], index: 2, kind: input, shape index: {}]   ;;  %s2157_s3 = inlined_call_operand.vmem [shape: f32[1,128], index: 3, kind: input, shape index: {}]   ;;  %s2158_s4 = inlined_call_operand.vmem [shape: f32[1,128], index: 4, kind: input, shape index: {}]   ;;  %s2159_s5 = inlined_call_operand.vmem [shape: f32[1,128], index: 5, kind: input, shape index: {}]   ;;  %s2160_s6 = inlined_call_operand.vmem [shape: f32[1,128], index: 6, kind: input, shape index: {}]   ;;  %s2161_s7 = inlined_call_operand.hbm [shape: f32[2,16,128], index: 7, kind: output, shape index: {}]  }
   0x1   :  { %14 = vsyncpa [#allocation3 + $0x1], 0  ;;  %s1727_s24 = smov 0   ;;  %s1729_s25 = smov 0  }
   0x2   :  { %s1731_s26 = smov 0   ;;  %s1733_s27 = smov 0  }
   0x3 LB: > { %s1748_s28 = sadd.s32 4294967295, %s1682_s27   ;;  %s987_s29 = sadd.s32 4294967294, %s1682_s27   ;;  %s1682_s27 = sphi %s1733_s27, %s2167_s27   ;;  %s1678_s26 = sphi %s1731_s26, %s2166_s26   ;;  %s1674_s25 = sphi %s1729_s25, %s2165_s25   ;;  %s1670_s24 = sphi %s1727_s24, %s2164_s24  }
   0x4   : > { %s1752_s30 = sadd.s32 1, %s1682_s27   ;;  %s179_s8 = sadd.s32 1, %s1678_s26 }
   0x5   : > { %s176_s9 = ssub.s32 %s1682_s27, %s1752_s30  ;;  %p189_p0 = scmp.ne.s32.totalorder %s1678_s26, %s1674_s25 }
   0x6   : > { %p177_p1 = scmp.eq.s32.totalorder %s176_s9, 0  ;;  %p190_p2 = scmp.eq.s32.totalorder %s1748_s28, 1 }
   0x7   : > { %p195_p3 = scmp.ne.s32.totalorder %s1674_s25, %s1670_s24  ;;  %p196_p4 = scmp.eq.s32.totalorder %s987_s29, 1 }
   0x8   : > { %s1763_s10 = scalar_select %p177_p1, %s1678_s26, %s179_s8  }
   0x9   : > { %p1765_p5 = por %p190_p2, %p189_p0  ;;  %p1769_p6 = por %p196_p4, %p195_p3 }
   0xa   : > { %p990_p7 = scmp.ge.s32.totalorder %s1682_s27, 1  ;;  %p240_p8 = scmp.lt.s32.totalorder %s1682_s27, 3 }
   0xc   : > { %p241_p9 = pnand %p990_p7, %p240_p8 }
   0xd   : > { %v279_v0 = vld [vmem:[%s2155_s1] sm:$0xff] (!%p241_p9)  ;;  %v280_v1 = vld [vmem:[%s2155_s1 + $0x8] sm:$0xff] (!%p241_p9)  ;;  %v281_v2 = vld [vmem:[%s2155_s1 + $0x10] sm:$0xff] (!%p241_p9)  ;;  %p272_p10 = scmp.lt.s32.totalorder (!%p241_p9), %s1748_s28, 1  ;;  %vm481_vm0 = vcmask (!%p241_p9), 1040384   ;;  %vm565_vm1 = vcmask (!%p241_p9), 1046528  }
   0xe   : > { %244 = sbr.rel (%p241_p9) target bundleno = 576 (0x240), region = 48  ;;  %v1387_v3 = vpack.c.bf16 (!%p241_p9), %v280_v1, %v279_v0  ;;  %v282_v4 = vld [vmem:[%s2155_s1 + $0x18] sm:$0xff] (!%p241_p9)  ;;  %v283_v6 = vld [vmem:[%s2155_s1 + $0x20] sm:$0xff] (!%p241_p9)  ;;  %v284_v7 = vld [vmem:[%s2155_s1 + $0x28] sm:$0xff] (!%p241_p9)  ;;  %s269_s22 = sand.u32 (!%p241_p9), 1, %s1674_s25  }
   0xf   : > { %v1391_v5 = vpack.c.bf16 (!%p241_p9), %v282_v4, %v281_v2  ;;  %v1395_v8 = vpack.c.bf16 (!%p241_p9), %v284_v7, %v283_v6  ;;  %v1010_v9 = vld [vmem:[%s2155_s1 + $0x100] sm:$0xff] (!%p241_p9)  ;;  %v1011_v10 = vld [vmem:[%s2155_s1 + $0x108] sm:$0xff] (!%p241_p9)  ;;  %v285_v11 = vld [vmem:[%s2155_s1 + $0x30] sm:$0xff] (!%p241_p9)  ;;  %s991_s23 = sshll.u32 (!%p241_p9), %s269_s22, 4  ;;  %s1684_s21 = smov (!%p241_p9), [#allocation2]  }
  0x10   : > { %1388 = vmatprep.subr.bf16.mxu0 (!%p241_p9), %v1387_v3  ;;  %v286_v12 = vld [vmem:[%s2155_s1 + $0x38] sm:$0xff] (!%p241_p9)  ;;  %v1419_v13 = vpack.c.bf16 (!%p241_p9), %v1011_v10, %v1010_v9  ;;  %v1012_v15 = vld [vmem:[%s2155_s1 + $0x110] sm:$0xff] (!%p241_p9)  ;;  %v1014_v18 = vld [vmem:[%s2155_s1 + $0x120] sm:$0xff] (!%p241_p9)  ;;  %s271_s14 = scalar_lea.vmem (!%p241_p9), [#allocation2], %s991_s23  ;;  %s1624_s23 = sshll.u32 (!%p241_p9), %s1684_s21, 4  ;;  %s1625_s23 = int_to_ptr.vmem [resolvable:$false] %s1624_s23 }
  0x11   : > { %1390 = vmatpush3.bf16.msra.mxu0 (!%p241_p9), %v1387_v3  ;;  %v1013_v16 = vld [vmem:[%s2155_s1 + $0x118] sm:$0xff] (!%p241_p9)  ;;  %v1399_v19 = vpack.c.bf16 (!%p241_p9), %v286_v12, %v285_v11  ;;  %v1015_v20 = vld [vmem:[%s2155_s1 + $0x128] sm:$0xff] (!%p241_p9)  ;;  %v287_v21 = vld [vmem:[%s2155_s1 + $0x40] sm:$0xff] (!%p241_p9)  ;;  %s925_s15 = sshll.u32 (!%p241_p9), %s271_s14, 4  ;;  %s1626_s29 = scalar_lea.vmem (!%p241_p9), %s1625_s23, 512  ;;  %s2111_s15 = int_to_ptr.vmem [resolvable:$true] %s925_s15 }
  0x12   : > { %1392 = vmatprep.subr.bf16.mxu0 (!%p241_p9), %v1391_v5  ;;  %1420 = vmatprep.subr.bf16.mxu1 (!%p241_p9), %v1419_v13  ;;  %v1423_v17 = vpack.c.bf16 (!%p241_p9), %v1013_v16, %v1012_v15  ;;  %v288_v22 = vld [vmem:[%s2155_s1 + $0x48] sm:$0xff] (!%p241_p9)  ;;  %v1427_v23 = vpack.c.bf16 (!%p241_p9), %v1015_v20, %v1014_v18  ;;  %v1016_v24 = vld [vmem:[%s2155_s1 + $0x130] sm:$0xff] (!%p241_p9)  ;;  %v1017_v25 = vld [vmem:[%s2155_s1 + $0x138] sm:$0xff] (!%p241_p9)  ;;  %s1620_s20 = scalar_lea.vmem (!%p241_p9), %s2111_s15, 256  ;;  %p1627_p0 = scmp.lt.s32.totalorder (!%p241_p9), %s2111_s15, %s1625_s23 }
  0x13   : > { %1422 = vmatpush3.bf16.msra.mxu1 (!%p241_p9), %v1419_v13  ;;  %v1403_v26 = vpack.c.bf16 (!%p241_p9), %v288_v22, %v287_v21  ;;  %v289_v27 = vld [vmem:[%s2155_s1 + $0x50] sm:$0xff] (!%p241_p9)  ;;  %v290_v28 = vld [vmem:[%s2155_s1 + $0x58] sm:$0xff] (!%p241_p9)  ;;  %v1431_v29 = vpack.c.bf16 (!%p241_p9), %v1017_v25, %v1016_v24  ;;  %v1018_v30 = vld [vmem:[%s2155_s1 + $0x140] sm:$0xff] (!%p241_p9)  ;;  %p1621_p11 = scmp.ne.s32.totalorder (!%p241_p9), %s2111_s15, %s1620_s20  ;;  %p1628_p1 = scmp.lt.s32.totalorder (!%p241_p9), %s1626_s29, %s1620_s20 }
  0x14   : > { %1424 = vmatprep.subr.bf16.mxu1 (!%p241_p9), %v1423_v17  ;;  %v1019_v31 = vld [vmem:[%s2155_s1 + $0x148] sm:$0xff] (!%p241_p9)  ;;  %v1407_v32 = vpack.c.bf16 (!%p241_p9), %v290_v28, %v289_v27  ;;  %v291_v33 = vld [vmem:[%s2155_s1 + $0x60] sm:$0xff] (!%p241_p9)  ;;  %v1020_v36 = vld [vmem:[%s2155_s1 + $0x150] sm:$0xff] (!%p241_p9) }
  0x15   : > { %s273_s8 = scalar_select %p272_p10, %s1748_s28, 1  ;;  %1394 = vmatpush3.bf16.msra.mxu0 %v1391_v5  ;;  %v292_v34 = vld [vmem:[%s2155_s1 + $0x68] sm:$0xff]  ;;  %v1435_v35 = vpack.c.bf16 %v1019_v31, %v1018_v30  ;;  %v1021_v37 = vld [vmem:[%s2155_s1 + $0x158] sm:$0xff]  ;;  %v293_v39 = vld [vmem:[%s2155_s1 + $0x70] sm:$0xff] }
  0x16   : > { %1396 = vmatprep.subr.bf16.mxu0 %v1395_v8  ;;  %v1411_v38 = vpack.c.bf16 %v292_v34, %v291_v33  ;;  %v294_v40 = vld [vmem:[%s2155_s1 + $0x78] sm:$0xff]  ;;  %v1439_v41 = vpack.c.bf16 %v1021_v37, %v1020_v36  ;;  %v1022_v42 = vld [vmem:[%s2155_s1 + $0x160] sm:$0xff]  ;;  %v1023_v43 = vld [vmem:[%s2155_s1 + $0x168] sm:$0xff]  ;;  %p1622_p12 = pnand %p1621_p11, %p1765_p5  ;;  %p1629_p2 = por %p1628_p1, %p1627_p0 }
  0x17   : > { %s1067_s9 = sshll.u32 %s273_s8, 4  ;;  %1426 = vmatpush3.bf16.msra.mxu1 %v1423_v17  ;;  %v1415_v44 = vpack.c.bf16 %v294_v40, %v293_v39  ;;  %v994_v45 = vld [vmem:[%s2155_s1 + $0x80] sm:$0xff]  ;;  %v995_v46 = vld [vmem:[%s2155_s1 + $0x88] sm:$0xff]  ;;  %v1443_v47 = vpack.c.bf16 %v1023_v43, %v1022_v42  ;;  %v1024_v48 = vld [vmem:[%s2155_s1 + $0x170] sm:$0xff] }
  0x18   : > { %s1804_s19 = scalar_lea.vmem %s2154_s0, %s1067_s9  ;;  %1428 = vmatprep.subr.bf16.mxu1 %v1427_v23  ;;  %v1025_v49 = vld [vmem:[%s2155_s1 + $0x178] sm:$0xff]  ;;  %v1451_v50 = vpack.c.bf16 %v995_v46, %v994_v45  ;;  %v996_v51 = vld [vmem:[%s2155_s1 + $0x90] sm:$0xff]  ;;  %v998_v56 = vld [vmem:[%s2155_s1 + $0xa0] sm:$0xff]  ;;  %p1623_p13 = pneg %p1622_p12 }
  0x19   : > { %v1813_v14 = vld [vmem:[%s1804_s19] sm:$0xff]  ;;  %1398 = vmatpush3.bf16.msra.mxu0 %v1395_v8  ;;  %v997_v52 = vld [vmem:[%s2155_s1 + $0x98] sm:$0xff]  ;;  %v1447_v53 = vpack.c.bf16 %v1025_v49, %v1024_v48  ;;  %v1896_v54 = vld [vmem:[%s1804_s19 + $0x8] sm:$0xff]  ;;  %s1068_s19 = sshll.u32 %s1748_s28, 8  ;;  %s2113_s28 = scalar_lea.sflag [#allocation3], %s269_s22 }
  0x1a   : > { %1209 = vmatprep.mubr.f32.mxu0 %v1813_v14  ;;  %1244 = vmatprep.mubr.f32.mxu1 %v1813_v14  ;;  %v1455_v55 = vpack.c.bf16 %v997_v52, %v996_v51  ;;  %v999_v57 = vld [vmem:[%s2155_s1 + $0xa8] sm:$0xff]  ;;  %v1000_v59 = vld [vmem:[%s2155_s1 + $0xb0] sm:$0xff]  ;;  %v1001_v60 = vld [vmem:[%s2155_s1 + $0xb8] sm:$0xff]  ;;  %s2109_s18 = scalar_lea.hbm %s2161_s7, %s1068_s19  ;;  %p1630_p3 = pnand %p1629_p2, %p1623_p13 }
  0x1b   : > { %1400 = vmatprep.subr.bf16.mxu0 %v1399_v19  ;;  %1430 = vmatpush3.bf16.msra.mxu1 %v1427_v23  ;;  %v1459_v58 = vpack.c.bf16 %v999_v57, %v998_v56  ;;  %v1463_v61 = vpack.c.bf16 %v1001_v60, %v1000_v59  ;;  %v1002_v62 = vld [vmem:[%s2155_s1 + $0xc0] sm:$0xff]  ;;  %v1003_v63 = vld [vmem:[%s2155_s1 + $0xc8] sm:$0xff]  ;;  %v1004_v1 = vld [vmem:[%s2155_s1 + $0xd0] sm:$0xff] }
  0x1c   : > { %1432 = vmatprep.subr.bf16.mxu1 %v1431_v29  ;;  %v1467_v0 = vpack.c.bf16 %v1003_v63, %v1002_v62  ;;  %v1005_v2 = vld [vmem:[%s2155_s1 + $0xd8] sm:$0xff]  ;;  %v1006_v4 = vld [vmem:[%s2155_s1 + $0xe0] sm:$0xff]  ;;  %v1007_v5 = vld [vmem:[%s2155_s1 + $0xe8] sm:$0xff] }
  0x1d   : > { %1402 = vmatpush3.bf16.msra.mxu0 %v1399_v19  ;;  %v1471_v3 = vpack.c.bf16 %v1005_v2, %v1004_v1  ;;  %v1475_v6 = vpack.c.bf16 %v1007_v5, %v1006_v4  ;;  %v1008_v7 = vld [vmem:[%s2155_s1 + $0xf0] sm:$0xff]  ;;  %v1009_v8 = vld [vmem:[%s2155_s1 + $0xf8] sm:$0xff]  ;;  %v594_v10 = vld [vmem:[%s2156_s2] sm:$0xff] }
  0x1e   : > { %1404 = vmatprep.subr.bf16.mxu0 %v1403_v26  ;;  %v1479_v9 = vpack.c.bf16 %v1009_v8, %v1008_v7  ;;  %v595_v11 = vld [vmem:[%s2156_s2 + $0x8] sm:$0xff]  ;;  %v1044_v12 = vld [vmem:[%s2156_s2 + $0x100] sm:$0xff]  ;;  %v596_v16 = vld [vmem:[%s2156_s2 + $0x10] sm:$0xff] }
  0x1f   : > { %1434 = vmatpush3.bf16.msra.mxu1 %v1431_v29  ;;  %v1483_v13 = vpack.c.bf16 %v595_v11, %v594_v10  ;;  %v1045_v15 = vld [vmem:[%s2156_s2 + $0x108] sm:$0xff]  ;;  %v597_v17 = vld [vmem:[%s2156_s2 + $0x18] sm:$0xff]  ;;  %v1046_v20 = vld [vmem:[%s2156_s2 + $0x110] sm:$0xff] }
  0x20   : > { %1436 = vmatprep.subr.bf16.mxu1 %v1435_v35  ;;  %v1515_v18 = vpack.c.bf16 %v1045_v15, %v1044_v12  ;;  %v1487_v19 = vpack.c.bf16 %v597_v17, %v596_v16  ;;  %v1047_v21 = vld [vmem:[%s2156_s2 + $0x118] sm:$0xff]  ;;  %v598_v22 = vld [vmem:[%s2156_s2 + $0x20] sm:$0xff]  ;;  %v599_v24 = vld [vmem:[%s2156_s2 + $0x28] sm:$0xff] }
  0x21   : > { %1406 = vmatpush3.bf16.msra.mxu0 %v1403_v26  ;;  %v1519_v23 = vpack.c.bf16 %v1047_v21, %v1046_v20  ;;  %v1048_v25 = vld [vmem:[%s2156_s2 + $0x120] sm:$0xff]  ;;  %v1049_v26 = vld [vmem:[%s2156_s2 + $0x128] sm:$0xff]  ;;  %v1491_v27 = vpack.c.bf16 %v599_v24, %v598_v22  ;;  %v600_v29 = vld [vmem:[%s2156_s2 + $0x30] sm:$0xff] }
  0x22   : > { %1408 = vmatprep.subr.bf16.mxu0 %v1407_v32  ;;  %v1523_v28 = vpack.c.bf16 %v1049_v26, %v1048_v25  ;;  %v601_v30 = vld [vmem:[%s2156_s2 + $0x38] sm:$0xff]  ;;  %v1050_v31 = vld [vmem:[%s2156_s2 + $0x130] sm:$0xff]  ;;  %v603_v36 = vld [vmem:[%s2156_s2 + $0x48] sm:$0xff] }
  0x23   : > { %1438 = vmatpush3.bf16.msra.mxu1 %v1435_v35  ;;  %v1495_v33 = vpack.c.bf16 %v601_v30, %v600_v29  ;;  %v602_v35 = vld [vmem:[%s2156_s2 + $0x40] sm:$0xff]  ;;  %v605_v42 = vld [vmem:[%s2156_s2 + $0x58] sm:$0xff]  ;;  %v607_v48 = vld [vmem:[%s2156_s2 + $0x68] sm:$0xff] }
  0x24   : > { %1440 = vmatprep.subr.bf16.mxu1 %v1439_v41  ;;  %v1052_v37 = vld [vmem:[%s2156_s2 + $0x140] sm:$0xff]  ;;  %v1499_v39 = vpack.c.bf16 %v603_v36, %v602_v35  ;;  %v1055_v45 = vld [vmem:[%s2156_s2 + $0x158] sm:$0xff]  ;;  %v1057_v51 = vld [vmem:[%s2156_s2 + $0x168] sm:$0xff] }
  0x25   : > { %1410 = vmatpush3.bf16.msra.mxu0 %v1407_v32  ;;  %v1051_v32 = vld [vmem:[%s2156_s2 + $0x138] sm:$0xff]  ;;  %v1058_v57 = vld [vmem:[%s2156_s2 + $0x170] sm:$0xff]  ;;  %v1028_v60 = vld [vmem:[%s2156_s2 + $0x80] sm:$0xff] }
  0x26   : > { %1412 = vmatprep.subr.bf16.mxu0 %v1411_v38  ;;  %v1527_v34 = vpack.c.bf16 %v1051_v32, %v1050_v31  ;;  %v1026_v15 = vld [vmem:[%s2157_s3] ss:$0 sm:$0xff]  ;;  %v1030_v24 = vld [vmem:[%s2156_s2 + $0x90] sm:$0xff]  ;;  %v1031_v25 = vld [vmem:[%s2156_s2 + $0x98] sm:$0xff] }
  0x27   : > { %1442 = vmatpush3.bf16.msra.mxu1 %v1439_v41  ;;  %v604_v41 = vld [vmem:[%s2156_s2 + $0x50] sm:$0xff]  ;;  %v1032_v29 = vld [vmem:[%s2156_s2 + $0xa0] sm:$0xff]  ;;  %v1033_v30 = vld [vmem:[%s2156_s2 + $0xa8] sm:$0xff] }
  0x28   : > { %1444 = vmatprep.subr.bf16.mxu1 %v1443_v47  ;;  %v1503_v43 = vpack.c.bf16 %v605_v42, %v604_v41  ;;  %v1555_v31 = vpack.c.bf16 %v1033_v30, %v1032_v29  ;;  %v1034_v32 = vld [vmem:[%s2156_s2 + $0xb0] sm:$0xff]  ;;  %v1036_v35 = vld [vmem:[%s2156_s2 + $0xc0] sm:$0xff]  ;;  %v1037_v36 = vld [vmem:[%s2156_s2 + $0xc8] sm:$0xff] }
  0x29   : > { %1414 = vmatpush3.bf16.msra.mxu0 %v1411_v38  ;;  %v1053_v38 = vld [vmem:[%s2156_s2 + $0x148] sm:$0xff]  ;;  %v1040_v41 = vld [vmem:[%s2156_s2 + $0xe0] sm:$0xff] }
  0x2a   : > { %1416 = vmatprep.subr.bf16.mxu0 %v1415_v44  ;;  %v1531_v40 = vpack.c.bf16 %v1053_v38, %v1052_v37  ;;  %v1563_v37 = vpack.c.bf16 %v1037_v36, %v1036_v35  ;;  %v1038_v38 = vld [vmem:[%s2156_s2 + $0xd0] sm:$0xff]  ;;  %v1041_v42 = vld [vmem:[%s2156_s2 + $0xe8] sm:$0xff] }
  0x2b   : > { %1446 = vmatpush3.bf16.msra.mxu1 %v1443_v47  ;;  %v606_v47 = vld [vmem:[%s2156_s2 + $0x60] sm:$0xff] }
  0x2c   : > { %1448 = vmatprep.subr.bf16.mxu1 %v1447_v53  ;;  %v1507_v49 = vpack.c.bf16 %v607_v48, %v606_v47 }
  0x2d   : > { %1418 = vmatpush3.bf16.msra.mxu0 %v1415_v44  ;;  %v1054_v44 = vld [vmem:[%s2156_s2 + $0x150] sm:$0xff] }
  0x2e   : > { %1452 = vmatprep.subr.bf16.mxu0 %v1451_v50  ;;  %v1535_v46 = vpack.c.bf16 %v1055_v45, %v1054_v44  ;;  %v1042_v44 = vld [vmem:[%s2156_s2 + $0xf0] sm:$0xff]  ;;  %v1043_v45 = vld [vmem:[%s2156_s2 + $0xf8] sm:$0xff] }
  0x2f   : > { %1450 = vmatpush3.bf16.msra.mxu1 %v1447_v53  ;;  %v608_v53 = vld [vmem:[%s2156_s2 + $0x70] sm:$0xff] }
  0x30   : > { %1210 = vmatmul.mubr.f32.vlgmr.msra.gmra.mrb[0].mxu0 %v1896_v54  ;;  %1484 = vmatprep.subr.bf16.mxu1 %v1483_v13 }
  0x31   : > { %1454 = vmatpush3.bf16.msra.mxu0 %v1451_v50  ;;  %1279 = vmatprep.mubr.f32.mxu0 %v1813_v14  ;;  %v1056_v50 = vld [vmem:[%s2156_s2 + $0x160] sm:$0xff] }
  0x32   : > { %1456 = vmatprep.subr.bf16.mxu0 %v1455_v55  ;;  %1245 = vmatmul.mubr.f32.vlgmr.msra.gmra.mrb[0].mxu1 %v1896_v54  ;;  %v1539_v52 = vpack.c.bf16 %v1057_v51, %v1056_v50 }
  0x33   : > { %1486 = vmatpush3.bf16.msra.mxu1 %v1483_v13 }
  0x34   : > { %1488 = vmatprep.subr.bf16.mxu1 %v1487_v19 }
  0x35   : > { %1458 = vmatpush3.bf16.msra.mxu0 %v1455_v55  ;;  %v609_v55 = vld [vmem:[%s2156_s2 + $0x78] sm:$0xff] }
  0x36   : > { %1460 = vmatprep.subr.bf16.mxu0 %v1459_v58  ;;  %v1511_v56 = vpack.c.bf16 %v609_v55, %v608_v53 }
  0x37   : > { %1490 = vmatpush3.bf16.msra.mxu1 %v1487_v19  ;;  %v1027_v19 = vld [vmem:[%s2158_s4] ss:$0 sm:$0xff] }
  0x38   : > { %1492 = vmatprep.subr.bf16.mxu1 %v1491_v27 }
  0x39   : > { %1462 = vmatpush3.bf16.msra.mxu0 %v1459_v58  ;;  %v1059_v58 = vld [vmem:[%s2156_s2 + $0x178] sm:$0xff] }
  0x3a   : > { %1464 = vmatprep.subr.bf16.mxu0 %v1463_v61  ;;  %v1543_v59 = vpack.c.bf16 %v1059_v58, %v1058_v57 }
  0x3b   : > { %1494 = vmatpush3.bf16.msra.mxu1 %v1491_v27 }
  0x3c   : > { %1496 = vmatprep.subr.bf16.mxu1 %v1495_v33 }
  0x3d   : > { %1466 = vmatpush3.bf16.msra.mxu0 %v1463_v61  ;;  %v1029_v61 = vld [vmem:[%s2156_s2 + $0x88] sm:$0xff] }
  0x3e   : > { %1468 = vmatprep.subr.bf16.mxu0 %v1467_v0  ;;  %v1547_v62 = vpack.c.bf16 %v1029_v61, %v1028_v60 }
  0x3f   : > { %1498 = vmatpush3.bf16.msra.mxu1 %v1495_v33  ;;  %v1035_v33 = vld [vmem:[%s2156_s2 + $0xb8] sm:$0xff] }
  0x40   : > { %1500 = vmatprep.subr.bf16.mxu1 %v1499_v39 }
  0x41   : > { %1470 = vmatpush3.bf16.msra.mxu0 %v1467_v0 }
  0x42   : > { %1472 = vmatprep.subr.bf16.mxu0 %v1471_v3 }
  0x43   : > { %1502 = vmatpush3.bf16.msra.mxu1 %v1499_v39  ;;  %v1039_v39 = vld [vmem:[%s2156_s2 + $0xd8] sm:$0xff] }
  0x44   : > { %1504 = vmatprep.subr.bf16.mxu1 %v1503_v43 }
  0x45   : > { %1474 = vmatpush3.bf16.msra.mxu0 %v1471_v3 }
  0x46   : > { %1476 = vmatprep.subr.bf16.mxu0 %v1475_v6 }
  0x47   : > { %1506 = vmatpush3.bf16.msra.mxu1 %v1503_v43  ;;  %v1571_v43 = vpack.c.bf16 %v1041_v42, %v1040_v41 }
  0x48   : > { %1508 = vmatprep.subr.bf16.mxu1 %v1507_v49 }
  0x49   : > { %1478 = vmatpush3.bf16.msra.mxu0 %v1475_v6 }
  0x4a   : > { %1480 = vmatprep.subr.bf16.mxu0 %v1479_v9 }
  0x4b   : > { %1510 = vmatpush3.bf16.msra.mxu1 %v1507_v49 }
  0x4c   : > { %1512 = vmatprep.subr.bf16.mxu1 %v1511_v56 }
  0x4d   : > { %1482 = vmatpush3.bf16.msra.mxu0 %v1479_v9 }
  0x4e   : > { %1516 = vmatprep.subr.bf16.mxu0 %v1515_v18 }
  0x4f   : > { %1514 = vmatpush3.bf16.msra.mxu1 %v1511_v56 }
  0x50   : > { %1280 = vmatmul.mubr.f32.vlgmr.msra.gmra.mrb[2].mxu0 %v1896_v54  ;;  %1548 = vmatprep.subr.bf16.mxu1 %v1547_v62 }
  0x51   : > { %1518 = vmatpush3.bf16.msra.mxu0 %v1515_v18 }
  0x52   : > { %1520 = vmatprep.subr.bf16.mxu0 %v1519_v23 }
  0x55   : > { %1522 = vmatpush3.bf16.msra.mxu0 %v1519_v23 }
  0x56   : > { %1524 = vmatprep.subr.bf16.mxu0 %v1523_v28 }
  0x59   : > { %1526 = vmatpush3.bf16.msra.mxu0 %v1523_v28  ;;  %v1551_v28 = vpack.c.bf16 %v1031_v25, %v1030_v24 }
  0x5a   : > { %1528 = vmatprep.subr.bf16.mxu0 %v1527_v34 }
  0x5d   : > { %1530 = vmatpush3.bf16.msra.mxu0 %v1527_v34  ;;  %v1559_v34 = vpack.c.bf16 %v1035_v33, %v1034_v32 }
  0x5e   : > { %1532 = vmatprep.subr.bf16.mxu0 %v1531_v40 }
  0x61   : > { %1534 = vmatpush3.bf16.msra.mxu0 %v1531_v40  ;;  %v1567_v40 = vpack.c.bf16 %v1039_v39, %v1038_v38 }
  0x62   : > { %1536 = vmatprep.subr.bf16.mxu0 %v1535_v46 }
  0x65   : > { %1538 = vmatpush3.bf16.msra.mxu0 %v1535_v46  ;;  %v1575_v46 = vpack.c.bf16 %v1043_v45, %v1042_v44 }
  0x66   : > { %1540 = vmatprep.subr.bf16.mxu0 %v1539_v52 }
  0x69   : > { %1542 = vmatpush3.bf16.msra.mxu0 %v1539_v52 }
  0x6a   : > { %1544 = vmatprep.subr.bf16.mxu0 %v1543_v59 }
  0x6d   : > { %1546 = vmatpush3.bf16.msra.mxu0 %v1543_v59 }
 0x103   : > { %v1211_v63 = vpop.f32.mrb[0].mxu0 }
 0x104   : > { %v483_v0 = vrot.slane %v1211_v63, 7  ;;  %v361_v1 = vpop.f32.mrb[1].mxu0  ;;  %v1060_v63 = vld [vmem:[%s2159_s5] ss:$0 sm:$0xff] }
 0x105   : > { %v482_v2 = vrot.slane %v361_v1, 7  ;;  %v1246_v4 = vpop.f32.mrb[0].mxu1 }
 0x106   : > { %v567_v5 = vrot.slane %v1246_v4, 1  ;;  %v470_v6 = vpop.f32.mrb[1].mxu1 }
 0x107   : > { %v484_v3 = vsel %vm481_vm0, %v482_v2, %v483_v0  ;;  %v566_v7 = vrot.slane %v470_v6, 1  ;;  %v487_v12 = vsel %vm481_vm0, 0.0, %v482_v2  ;;  %v1061_v2 = vld [vmem:[%s2160_s6] ss:$0 sm:$0xff] }
 0x108   : > { %v571_v9 = vsel %vm565_vm1, %v567_v5, 0.0 }
 0x109   : > { %v568_v8 = vsel %vm565_vm1, %v566_v7, %v567_v5 }
 0x123   : > { %v1281_v10 = vpop.f32.mrb[2].mxu0 }
 0x124   : > { %v560_v11 = vadd.f32 %v1281_v10, %v484_v3  ;;  %v554_v13 = vpop.f32.mrb[3].mxu0 }
 0x125   : > { %v555_v16 = vadd.f32 %v554_v13, %v487_v12 }
 0x126   : > { %v573_v17 = vadd.f32 %v571_v9, %v560_v11 }
 0x127   : > { %v572_v18 = vadd.f32 %v568_v8, %v555_v16 }
 0x128   : > { %v582_v20 = vmul.f32 %v1026_v15, %v573_v17 }
 0x129   : > { %v581_v21 = vmul.f32 %v1026_v15, %v572_v18 }
 0x12a   : > { %v591_v22 = vadd.f32 %v1027_v19, %v582_v20 }
 0x12b   : > { %v590_v23 = vadd.f32 %v1027_v19, %v581_v21 }
 0x12c   : > { %v593_v27 = vmax.f32 %v591_v22, 0.0 }
 0x12d   : > { %v592_v26 = vmax.f32 %v590_v23, 0.0 }
 0x12f   : > { %1314 = vmatprep.mubr.f32.mxu1 %v592_v26  ;;  %1349 = vmatprep.mubr.f32.mxu0 %v592_v26 }
 0x130   : > { %1315 = vmatmul.mubr.f32.vlgmr.msra.gmra.mrb[2].mxu1 %v593_v27  ;;  %1350 = vmatmul.mubr.f32.vlgmr.msra.gmra.mrb[4].mxu0 %v593_v27 }
 0x131   : > { %1550 = vmatpush3.bf16.msra.mxu1 %v1547_v62  ;;  %1384 = vmatprep.mubr.f32.mxu1 %v592_v26 }
 0x132   : > { %1552 = vmatprep.subr.bf16.mxu1 %v1551_v28 }
 0x135   : > { %1554 = vmatpush3.bf16.msra.mxu1 %v1551_v28 }
 0x136   : > { %1556 = vmatprep.subr.bf16.mxu1 %v1555_v31 }
 0x139   : > { %1558 = vmatpush3.bf16.msra.mxu1 %v1555_v31 }
 0x13a   : > { %1560 = vmatprep.subr.bf16.mxu1 %v1559_v34 }
 0x13d   : > { %1562 = vmatpush3.bf16.msra.mxu1 %v1559_v34 }
 0x13e   : > { %1564 = vmatprep.subr.bf16.mxu1 %v1563_v37 }
 0x141   : > { %1566 = vmatpush3.bf16.msra.mxu1 %v1563_v37 }
 0x142   : > { %1568 = vmatprep.subr.bf16.mxu1 %v1567_v40 }
 0x145   : > { %1570 = vmatpush3.bf16.msra.mxu1 %v1567_v40 }
 0x146   : > { %1572 = vmatprep.subr.bf16.mxu1 %v1571_v43 }
 0x149   : > { %1574 = vmatpush3.bf16.msra.mxu1 %v1571_v43 }
 0x14a   : > { %1576 = vmatprep.subr.bf16.mxu1 %v1575_v46 }
 0x14d   : > { %1578 = vmatpush3.bf16.msra.mxu1 %v1575_v46 }
 0x150   : > { %1385 = vmatmul.mubr.f32.vlgmr.msra.gmra.mrb[4].mxu1 %v593_v27 }
 0x203   : > { %v1316_v47 = vpop.f32.mrb[2].mxu1  ;;  %v1351_v48 = vpop.f32.mrb[4].mxu0 }
 0x204   : > { %v797_v49 = vrot.slane %v1316_v47, 7  ;;  %v880_v50 = vrot.slane %v1351_v48, 1  ;;  %v676_v51 = vpop.f32.mrb[3].mxu1  ;;  %v785_v52 = vpop.f32.mrb[5].mxu0 }
 0x205   : > { %v796_v53 = vrot.slane %v676_v51, 7  ;;  %v879_v55 = vrot.slane %v785_v52, 1 }
 0x206   : > { %v884_v62 = vsel %vm565_vm1, %v880_v50, 0.0 }
 0x207   : > { %v798_v56 = vsel %vm481_vm0, %v796_v53, %v797_v49  ;;  %v881_v57 = vsel %vm565_vm1, %v879_v55, %v880_v50  ;;  %v801_v60 = vsel %vm481_vm0, 0.0, %v796_v53 }
 0x223   : > { %v1386_v58 = vpop.f32.mrb[4].mxu1 }
 0x224   : > { %v874_v59 = vadd.f32 %v1386_v58, %v798_v56  ;;  %v868_v61 = vpop.f32.mrb[5].mxu1 }
 0x225   : > { %v869_v0 = vadd.f32 %v868_v61, %v801_v60 }
 0x226   : > { %v886_v1 = vadd.f32 %v884_v62, %v874_v59 }
 0x227   : > { %v885_v3 = vadd.f32 %v881_v57, %v869_v0 }
 0x228   : > { %v895_v4 = vmul.f32 %v1060_v63, %v886_v1 }
 0x229   : > { %v894_v5 = vmul.f32 %v1060_v63, %v885_v3 }
 0x22a   : > { %v904_v6 = vadd.f32 %v1061_v2, %v895_v4 }
 0x22b   : > { %v903_v7 = vadd.f32 %v1061_v2, %v894_v5 }
 0x22c   : > { %v906_v8 = vadd.f32 %v904_v6, %v1896_v54 }
 0x22d   : > { %v905_v9 = vadd.f32 %v903_v7, %v1813_v14 }
 0x22e   : > { %v908_v10 = vmax.f32 %v906_v8, 0.0 }
 0x22f   : > { %v907_v11 = vmax.f32 %v905_v9, 0.0 }
 0x230   : > { %910 = vst [vmem:[%s271_s14 + $0x8] sm:$0xff] %v908_v10 }
 0x231   : > { %909 = vst [vmem:[%s271_s14] sm:$0xff] %v907_v11 }
 0x232   : > { %1633 = shalt.err (!%p1630_p3)
}
 0x233   : > { %s1634_s22 = scalar_lea.hbm %s2109_s18, 256  ;;  %s1638_s13 = scalar_lea.hbm %s2161_s7, 512 }
 0x234   : > { %p1635_p4 = scmp.ne.s32.totalorder %s2109_s18, %s1634_s22  ;;  %p1639_p9 = scmp.lt.u32.totalorder %s2109_s18, %s2161_s7 }
 0x235   : > { %p1640_p10 = scmp.lt.u32.totalorder %s1638_s13, %s1634_s22  ;;  %p1642_p12 = scmp.lt.u32.totalorder %s1634_s22, %s2109_s18 }
 0x236   : > { %p1636_p7 = pnand %p1635_p4, %p1765_p5 }
 0x237   : > { %p1641_p11 = por %p1640_p10, %p1639_p9 }
 0x238   : > { %p1637_p8 = pneg %p1636_p7 }
 0x239   : > { %p1643_p13 = por %p1642_p12, %p1641_p11 }
 0x23b   : > { %p1644_p0 = pnand %p1643_p13, %p1637_p8 }
 0x23d   : > { %1647 = shalt.err (!%p1644_p0)
}
 0x23e   : > { %s1685_s16 = smov 128   ;;  %s1686_s17 = smov 8  }
 0x23f   : > { %1579 = dma.vmem_to_hbm [thread:$0]  (%p1765_p5), %s2111_s15, 256, %s2109_s18, %s2113_s28, %s1685_s16, %s1685_s16, %s1686_s17  }
 0x240 PF: > { %p1585_p1 = scmp.ge.s32.totalorder %s1682_s27, 2  ;;  %s940_s20 = sand.u32 1, %s1670_s24  }
 0x241   : > { %s941_s21 = scalar_lea.sflag [#allocation3], %s940_s20 }
 0x242   : > { %p1582_p2 = pnand %p1585_p1, %p1769_p6 }
 0x244   : > { %1665 = dma.done.wait (!%p1582_p2), %s941_s21, 256  }
 0x245   : > { %1667 = vsyncadd (!%p1582_p2), %s941_s21, 4294967040  ;;  %p17_p3 = scmp.ge.s32.totalorder %s1752_s30, 4   ;;  %s2164_s24 = smov %s1674_s25 }
 0x246   : > { %s2165_s25 = smov %s1678_s26  ;;  %s2166_s26 = smov %s1763_s10 }
 0x247   : > { %s2167_s27 = smov %s1752_s30  ;;  %19 = sbr.rel (!%p17_p3) target bundleno = 3 (0x3), region = 87 }
 0x24e   :  { %946 = vsyncpa [#allocation3], 1 }
 0x24f   :  { %948 = vsyncpa [#allocation3 + $0x1], 1 }

</bundles_post_ra>
